<compile_context>
chip_gen: v7x
topology: tpu7x:2x2x1
jax: 0.10.0
libtpu: 0.0.40
codegen_flags: <defaults>
</compile_context>

<pallas_src>
import jax
import jax.numpy as jnp
from jax.experimental import pallas as pl
from jax.experimental.pallas import tpu as pltpu


# ----------------------------------------------------------------------------
# Kernel: one grid point == (block b, batch tile i) of the block-diagonal GRU.
#   x_ref   : (1, bt, ginp)       bf16
#   h_ref   : (1, bt, ghid)       f32
#   wih_ref : (1, ginp, 3*ghid)   bf16   (pre-masked, pre-transposed, gate-major)
#   whh_ref : (1, ghid, 3*ghid)   bf16
#   b_ref   : (1, 2, 3*ghid)      f32    (row 0 = b_ih, row 1 = b_hh)
#   o_ref   : (1, bt, ghid)       f32
# Gate order along the 3*ghid axis follows PyTorch GRUCell: [reset, update, new].
# ----------------------------------------------------------------------------
def block_gru_kernel(x_ref, h_ref, wih_ref, whh_ref, b_ref, o_ref):
    x = x_ref[0]                       # (bt, ginp)  bf16
    h = h_ref[0]                       # (bt, ghid)  f32
    w_ih = wih_ref[0]                  # (ginp, 3*ghid) bf16
    w_hh = whh_ref[0]                  # (ghid, 3*ghid) bf16
    b = b_ref[0]                       # (2, 3*ghid)  f32
    ghid = h.shape[-1]

    # MXU matmuls: bf16 inputs, f32 accumulation.
    gi = jnp.dot(x, w_ih, preferred_element_type=jnp.float32) + b[0:1]
    gh = jnp.dot(h.astype(w_hh.dtype), w_hh,
                 preferred_element_type=jnp.float32) + b[1:2]

    i_r, i_z, i_n = gi[:, :ghid], gi[:, ghid:2 * ghid], gi[:, 2 * ghid:]
    h_r, h_z, h_n = gh[:, :ghid], gh[:, ghid:2 * ghid], gh[:, 2 * ghid:]

    # Gate math stays in f32 (EUP sigmoid/tanh; VPU blend).
    r = jax.nn.sigmoid(i_r + h_r)
    z = jax.nn.sigmoid(i_z + h_z)
    n = jnp.tanh(i_n + r * h_n)

    # h' = (1 - z) * n + z * h  ==  n + z * (h - n)
    o_ref[0] = (n + z * (h - n)).astype(o_ref.dtype)


# ----------------------------------------------------------------------------
# One-time parameter preparation (blockify_params() + transpose, hoisted out of
# the hot path).  Extracting the diagonal (ghid x ginp) blocks IS the
# application of mask_hx / mask_hh: everything else is zero and contributes
# nothing to the matmuls.
# ----------------------------------------------------------------------------
def prepare_block_gru_params(w_ih, w_hh, b_ih, b_hh, k, weight_dtype=jnp.bfloat16):
    """w_ih:(3*nhid,ninp) w_hh:(3*nhid,nhid) b_*:(3*nhid,)  (PyTorch layout)."""
    nhid = w_hh.shape[1]
    ninp = w_ih.shape[1]
    ghid, ginp = nhid // k, ninp // k

    wih5 = w_ih.reshape(3, k, ghid, k, ginp)   # (gate, row-blk, out, col-blk, in)
    whh5 = w_hh.reshape(3, k, ghid, k, ghid)

    # Diagonal blocks only (== masked weights); k is a small static int.
    wih_blocks = jnp.stack([wih5[:, b, :, b, :] for b in range(k)])  # (k,3,ghid,ginp)
    whh_blocks = jnp.stack([whh5[:, b, :, b, :] for b in range(k)])  # (k,3,ghid,ghid)

    # Transpose so the kernel computes x_b @ W : (k, in, 3*ghid), gate-major.
    wih_c = jnp.transpose(wih_blocks, (0, 3, 1, 2)).reshape(k, ginp, 3 * ghid)
    whh_c = jnp.transpose(whh_blocks, (0, 3, 1, 2)).reshape(k, ghid, 3 * ghid)
    wih_c = wih_c.astype(weight_dtype)
    whh_c = whh_c.astype(weight_dtype)

    bih_c = jnp.transpose(b_ih.reshape(3, k, ghid), (1, 0, 2)).reshape(k, 3 * ghid)
    bhh_c = jnp.transpose(b_hh.reshape(3, k, ghid), (1, 0, 2)).reshape(k, 3 * ghid)
    b_c = jnp.stack([bih_c, bhh_c], axis=1).astype(jnp.float32)      # (k, 2, 3*ghid)
    return wih_c, whh_c, b_c


def _pick_batch_tile(B):
    """Full batch if small; else the largest of {512,256,128} dividing B (keeps
    the second-to-last block dim a multiple of 8 and bounds VMEM for huge B)."""
    for t in (512, 256, 128):
        if B > t and B % t == 0:
            return t
    return B


# ----------------------------------------------------------------------------
# Forward wrapper: x:(B,ninp) h:(B,nhid) -> h':(B,nhid)
# ----------------------------------------------------------------------------
def block_gru_forward(x, h, params):
    wih_c, whh_c, b_c = params
    k, ginp, g3 = wih_c.shape
    ghid = g3 // 3
    B = x.shape[0]
    bt = _pick_batch_tile(B)

    # Block-major activation layout (cheap vs. the weight traffic it enables;
    # keeps every BlockSpec's last-two dims full / aligned).
    x_blocks = jnp.transpose(x.reshape(B, k, ginp), (1, 0, 2)).astype(jnp.bfloat16)
    h_blocks = jnp.transpose(h.reshape(B, k, ghid), (1, 0, 2)).astype(jnp.float32)

    out_blocks = pl.pallas_call(
        block_gru_kernel,
        out_shape=jax.ShapeDtypeStruct((k, B, ghid), jnp.float32),
        grid=(k, B // bt),                  # k outer -> weights resident per block
        in_specs=[
            pl.BlockSpec((1, bt, ginp), lambda b, i: (b, i, 0)),   # x block
            pl.BlockSpec((1, bt, ghid), lambda b, i: (b, i, 0)),   # h block
            pl.BlockSpec((1, ginp, g3), lambda b, i: (b, 0, 0)),   # W_ih block
            pl.BlockSpec((1, ghid, g3), lambda b, i: (b, 0, 0)),   # W_hh block
            pl.BlockSpec((1, 2, g3), lambda b, i: (b, 0, 0)),      # biases
        ],
        out_specs=pl.BlockSpec((1, bt, ghid), lambda b, i: (b, i, 0)),
        compiler_params=pltpu.CompilerParams(
            dimension_semantics=("parallel", "parallel")),         # all independent
    )(x_blocks, h_blocks, wih_c, whh_c, b_c)

    return jnp.transpose(out_blocks, (1, 0, 2)).reshape(B, k * ghid).astype(h.dtype)


# ----------------------------------------------------------------------------
# Pure-JAX f32 reference replicating torch.nn.GRUCell with masked weights.
# ----------------------------------------------------------------------------
def make_block_masks(ninp, nhid, k):
    ghid, ginp = nhid // k, ninp // k
    eye = jnp.eye(k, dtype=jnp.float32)
    mhx = jnp.repeat(jnp.repeat(eye, ghid, axis=0), ginp, axis=1)   # (nhid, ninp)
    mask_hx = jnp.tile(mhx, (3, 1))                                 # (3*nhid, ninp)
    mhh = jnp.repeat(jnp.repeat(eye, ghid, axis=0), ghid, axis=1)   # (nhid, nhid)
    mask_hh = jnp.tile(mhh, (3, 1))                                 # (3*nhid, nhid)
    return mask_hx, mask_hh


def reference_block_gru(x, h, w_ih, w_hh, b_ih, b_hh, mask_hx, mask_hh):
    nhid = h.shape[1]
    gi = x @ (w_ih * mask_hx).T + b_ih
    gh = h @ (w_hh * mask_hh).T + b_hh
    i_r, i_z, i_n = gi[:, :nhid], gi[:, nhid:2 * nhid], gi[:, 2 * nhid:]
    h_r, h_z, h_n = gh[:, :nhid], gh[:, nhid:2 * nhid], gh[:, 2 * nhid:]
    r = jax.nn.sigmoid(i_r + h_r)
    z = jax.nn.sigmoid(i_z + h_z)
    n = jnp.tanh(i_n + r * h_n)
    return (1.0 - z) * n + z * h


if __name__ == "__main__":
    # Small shapes consistent with the module: ninp % k == 0, nhid % k == 0.
    B, ninp, nhid, k = 8, 16, 32, 4

    key = jax.random.PRNGKey(0)
    kx, kh, k1, k2, k3, k4 = jax.random.split(key, 6)

    x = jax.random.normal(kx, (B, ninp), dtype=jnp.float32)
    h = jax.random.normal(kh, (B, nhid), dtype=jnp.float32)

    # PyTorch GRUCell init: U(-1/sqrt(nhid), 1/sqrt(nhid)).
    bound = 1.0 / jnp.sqrt(jnp.float32(nhid))
    w_ih = jax.random.uniform(k1, (3 * nhid, ninp), jnp.float32, -bound, bound)
    w_hh = jax.random.uniform(k2, (3 * nhid, nhid), jnp.float32, -bound, bound)
    b_ih = jax.random.uniform(k3, (3 * nhid,), jnp.float32, -bound, bound)
    b_hh = jax.random.uniform(k4, (3 * nhid,), jnp.float32, -bound, bound)

    # One-time setup (replaces blockify_params + per-call transposes/masks).
    params = prepare_block_gru_params(w_ih, w_hh, b_ih, b_hh, k)

    out = block_gru_forward(x, h, params)
    out = jax.block_until_ready(out)

    mask_hx, mask_hh = make_block_masks(ninp, nhid, k)
    ref = reference_block_gru(x, h, w_ih, w_hh, b_ih, b_hh, mask_hx, mask_hh)

    assert out.shape == (B, nhid)
    # bf16 weights/x with f32 accumulation -> loosened tolerance vs. f32 reference.
    assert jnp.allclose(out, ref, atol=3e-2, rtol=3e-2), \
        f"max abs diff = {jnp.max(jnp.abs(out - ref))}"

    print("KERNEL_OK")
</pallas_src>

<mosaic_0001>
module attributes {stable_mosaic.version = 11 : i64} {
  func.func @block_gru_kernel(%arg0: i32, %arg1: i32, %arg2: memref<1x8x4xbf16, #tpu.memory_space<vmem>>, %arg3: memref<1x8x8xf32, #tpu.memory_space<vmem>>, %arg4: memref<1x4x24xbf16, #tpu.memory_space<vmem>>, %arg5: memref<1x8x24xbf16, #tpu.memory_space<vmem>>, %arg6: memref<1x2x24xf32, #tpu.memory_space<vmem>>, %arg7: memref<1x8x8xf32, #tpu.memory_space<vmem>>) attributes {dimension_semantics = [#tpu.dimension_semantics<parallel>, #tpu.dimension_semantics<parallel>], iteration_bounds = array<i64: 4, 1>, scalar_prefetch = 0 : i64, scratch_operands = 0 : i64, tpu.core_type = #tpu.core_type<tc>, window_params = [{transform_indices = @transform_0, window_bounds = array<i64: 1, 8, 4>}, {transform_indices = @transform_1, window_bounds = array<i64: 1, 8, 8>}, {transform_indices = @transform_2, window_bounds = array<i64: 1, 4, 24>}, {transform_indices = @transform_3, window_bounds = array<i64: 1, 8, 24>}, {transform_indices = @transform_4, window_bounds = array<i64: 1, 2, 24>}, {transform_indices = @transform_5, window_bounds = array<i64: 1, 8, 8>}]} {
    %c0 = arith.constant 0 : index
    %c0_0 = arith.constant 0 : index
    %c0_1 = arith.constant 0 : index
    %0 = vector.load %arg2[%c0, %c0_0, %c0_1] : memref<1x8x4xbf16, #tpu.memory_space<vmem>>, vector<1x8x4xbf16>
    %1 = vector.shape_cast %0 : vector<1x8x4xbf16> to vector<8x4xbf16>
    %c0_2 = arith.constant 0 : index
    %c0_3 = arith.constant 0 : index
    %c0_4 = arith.constant 0 : index
    %2 = vector.load %arg3[%c0_2, %c0_3, %c0_4] : memref<1x8x8xf32, #tpu.memory_space<vmem>>, vector<1x8x8xf32>
    %3 = vector.shape_cast %2 : vector<1x8x8xf32> to vector<8x8xf32>
    %c0_5 = arith.constant 0 : index
    %c0_6 = arith.constant 0 : index
    %c0_7 = arith.constant 0 : index
    %4 = vector.load %arg4[%c0_5, %c0_6, %c0_7] : memref<1x4x24xbf16, #tpu.memory_space<vmem>>, vector<1x4x24xbf16>
    %5 = vector.shape_cast %4 : vector<1x4x24xbf16> to vector<4x24xbf16>
    %c0_8 = arith.constant 0 : index
    %c0_9 = arith.constant 0 : index
    %c0_10 = arith.constant 0 : index
    %6 = vector.load %arg5[%c0_8, %c0_9, %c0_10] : memref<1x8x24xbf16, #tpu.memory_space<vmem>>, vector<1x8x24xbf16>
    %7 = vector.shape_cast %6 : vector<1x8x24xbf16> to vector<8x24xbf16>
    %c0_11 = arith.constant 0 : index
    %c0_12 = arith.constant 0 : index
    %c0_13 = arith.constant 0 : index
    %8 = vector.load %arg6[%c0_11, %c0_12, %c0_13] : memref<1x2x24xf32, #tpu.memory_space<vmem>>, vector<1x2x24xf32>
    %9 = vector.shape_cast %8 : vector<1x2x24xf32> to vector<2x24xf32>
    %cst = arith.constant dense<0.000000e+00> : vector<8x24xf32>
    %10 = tpu.matmul %1, %5, %cst {dimension_numbers = #tpu.dot_dimension_numbers<[1], [0], [0], [1], [0, 0, 1, 1], [], []>} : vector<8x4xbf16>, vector<4x24xbf16>, vector<8x24xf32> -> vector<8x24xf32>
    %11 = vector.extract_strided_slice %9 {offsets = [0, 0], sizes = [1, 24], strides = [1, 1]} : vector<2x24xf32> to vector<1x24xf32>
    %12 = vector.broadcast %11 : vector<1x24xf32> to vector<8x24xf32>
    %13 = arith.addf %10, %12 : vector<8x24xf32>
    %14 = arith.truncf %3 : vector<8x8xf32> to vector<8x8xbf16>
    %cst_14 = arith.constant dense<0.000000e+00> : vector<8x24xf32>
    %15 = tpu.matmul %14, %7, %cst_14 {dimension_numbers = #tpu.dot_dimension_numbers<[1], [0], [0], [1], [0, 0, 1, 1], [], []>} : vector<8x8xbf16>, vector<8x24xbf16>, vector<8x24xf32> -> vector<8x24xf32>
    %16 = vector.extract_strided_slice %9 {offsets = [1, 0], sizes = [1, 24], strides = [1, 1]} : vector<2x24xf32> to vector<1x24xf32>
    %17 = vector.broadcast %16 : vector<1x24xf32> to vector<8x24xf32>
    %18 = arith.addf %15, %17 : vector<8x24xf32>
    %19 = vector.extract_strided_slice %13 {offsets = [0, 0], sizes = [8, 8], strides = [1, 1]} : vector<8x24xf32> to vector<8x8xf32>
    %20 = vector.extract_strided_slice %13 {offsets = [0, 8], sizes = [8, 8], strides = [1, 1]} : vector<8x24xf32> to vector<8x8xf32>
    %21 = vector.extract_strided_slice %13 {offsets = [0, 16], sizes = [8, 8], strides = [1, 1]} : vector<8x24xf32> to vector<8x8xf32>
    %22 = vector.extract_strided_slice %18 {offsets = [0, 0], sizes = [8, 8], strides = [1, 1]} : vector<8x24xf32> to vector<8x8xf32>
    %23 = vector.extract_strided_slice %18 {offsets = [0, 8], sizes = [8, 8], strides = [1, 1]} : vector<8x24xf32> to vector<8x8xf32>
    %24 = vector.extract_strided_slice %18 {offsets = [0, 16], sizes = [8, 8], strides = [1, 1]} : vector<8x24xf32> to vector<8x8xf32>
    %25 = arith.addf %19, %22 : vector<8x8xf32>
    %26 = arith.negf %25 : vector<8x8xf32>
    %27 = math.exp %26 : vector<8x8xf32>
    %cst_15 = arith.constant 1.000000e+00 : f32
    %28 = vector.broadcast %cst_15 : f32 to vector<8x8xf32>
    %29 = arith.addf %28, %27 : vector<8x8xf32>
    %30 = arith.divf %28, %29 : vector<8x8xf32>
    %31 = arith.addf %20, %23 : vector<8x8xf32>
    %32 = arith.negf %31 : vector<8x8xf32>
    %33 = math.exp %32 : vector<8x8xf32>
    %cst_16 = arith.constant 1.000000e+00 : f32
    %34 = vector.broadcast %cst_16 : f32 to vector<8x8xf32>
    %35 = arith.addf %34, %33 : vector<8x8xf32>
    %36 = arith.divf %34, %35 : vector<8x8xf32>
    %37 = arith.mulf %30, %24 : vector<8x8xf32>
    %38 = arith.addf %21, %37 : vector<8x8xf32>
    %39 = math.tanh %38 : vector<8x8xf32>
    %40 = arith.subf %3, %39 : vector<8x8xf32>
    %41 = arith.mulf %36, %40 : vector<8x8xf32>
    %42 = arith.addf %39, %41 : vector<8x8xf32>
    %c0_17 = arith.constant 0 : index
    %c0_18 = arith.constant 0 : index
    %c0_19 = arith.constant 0 : index
    %43 = vector.load %arg7[%c0_17, %c0_18, %c0_19] : memref<1x8x8xf32, #tpu.memory_space<vmem>>, vector<1x8x8xf32>
    %44 = vector.shape_cast %43 : vector<1x8x8xf32> to vector<8x8xf32>
    %45 = vector.shape_cast %42 : vector<8x8xf32> to vector<1x8x8xf32>
    tpu.vector_store %arg7[%c0_17, %c0_18, %c0_19], %45 {strides = array<i32>} : memref<1x8x8xf32, #tpu.memory_space<vmem>>, vector<1x8x8xf32>,
    return
  }
  func.func @transform_0(%arg0: i32, %arg1: i32) -> (i32, i32, i32) {
    %c0_i32 = arith.constant 0 : i32
    %c0_i32_0 = arith.constant 0 : i32
    return %arg0, %arg1, %c0_i32 : i32, i32, i32
  }
  func.func @transform_1(%arg0: i32, %arg1: i32) -> (i32, i32, i32) {
    %c0_i32 = arith.constant 0 : i32
    %c0_i32_0 = arith.constant 0 : i32
    return %arg0, %arg1, %c0_i32 : i32, i32, i32
  }
  func.func @transform_2(%arg0: i32, %arg1: i32) -> (i32, i32, i32) {
    %c0_i32 = arith.constant 0 : i32
    %c0_i32_0 = arith.constant 0 : i32
    %c0_i32_1 = arith.constant 0 : i32
    return %arg0, %c0_i32, %c0_i32_0 : i32, i32, i32
  }
  func.func @transform_3(%arg0: i32, %arg1: i32) -> (i32, i32, i32) {
    %c0_i32 = arith.constant 0 : i32
    %c0_i32_0 = arith.constant 0 : i32
    %c0_i32_1 = arith.constant 0 : i32
    return %arg0, %c0_i32, %c0_i32_0 : i32, i32, i32
  }
  func.func @transform_4(%arg0: i32, %arg1: i32) -> (i32, i32, i32) {
    %c0_i32 = arith.constant 0 : i32
    %c0_i32_0 = arith.constant 0 : i32
    %c0_i32_1 = arith.constant 0 : i32
    return %arg0, %c0_i32, %c0_i32_0 : i32, i32, i32
  }
  func.func @transform_5(%arg0: i32, %arg1: i32) -> (i32, i32, i32) {
    %c0_i32 = arith.constant 0 : i32
    %c0_i32_0 = arith.constant 0 : i32
    return %arg0, %arg1, %c0_i32 : i32, i32, i32
  }
}

</mosaic_0001>

<bundles_post_ra>
// kernel: tpu_custom_call.1
= control target key start
LH: loop header
LB: loop body
LE: loop exit
PB: predicated region body
PF: predicated region fallthrough
CT: control target
= control target key end

     0   :  { %10 = vsyncpa [#allocation3], 0  ;;  %s1084_s0 = inlined_call_operand.vmem [shape: bf16[4,8,4], index: 0, kind: input, shape index: {}]   ;;  %s1085_s1 = inlined_call_operand.hbm [shape: f32[4,8,8], index: 1, kind: input, shape index: {}]   ;;  %s1086_s2 = inlined_call_operand.vmem [shape: bf16[4,4,24], index: 2, kind: input, shape index: {}]   ;;  %s1087_s3 = inlined_call_operand.vmem [shape: bf16[4,8,24], index: 3, kind: input, shape index: {}]   ;;  %s1088_s4 = inlined_call_operand.vmem [shape: f32[4,2,24], index: 4, kind: input, shape index: {}]   ;;  %s1089_s5 = inlined_call_operand.hbm [shape: f32[4,8,8], index: 5, kind: output, shape index: {}]  }
   0x1   :  { %12 = vsyncpa [#allocation3 + $0x1], 0 }
   0x2   :  { %13 = vsyncpa [#allocation4], 0 }
   0x3   :  { %15 = vsyncpa [#allocation4 + $0x1], 0  ;;  %s891_s18 = smov 0   ;;  %s893_s19 = smov 0  }
   0x4   :  { %s895_s20 = smov 0   ;;  %s897_s21 = smov 0  }
   0x5   :  { %s899_s22 = smov 0   ;;  %s901_s23 = smov 0  }
   0x6 LB: > { %s631_s24 = sadd.s32 4294967295, %s852_s23   ;;  %s632_s25 = sadd.s32 4294967294, %s852_s23   ;;  %s852_s23 = sphi %s901_s23, %s21_s23   ;;  %s848_s22 = sphi %s899_s22, %s1104_s22   ;;  %s844_s21 = sphi %s897_s21, %s1103_s21   ;;  %s840_s20 = sphi %s895_s20, %s1102_s20   ;;  %s836_s19 = sphi %s893_s19, %s1101_s19   ;;  %s832_s18 = sphi %s891_s18, %s1100_s18  }
   0x7   : > { %s33_s26 = sadd.s32 1, %s848_s22  ;;  %s70_s27 = sadd.s32 1, %s840_s20 }
   0x8   : > { %p35_p0 = scmp.ge.s32.totalorder %s33_s26, 4  ;;  %p77_p1 = scmp.ne.s32.totalorder %s840_s20, %s836_s19 }
   0x9   : > { %p78_p2 = scmp.eq.s32.totalorder %s852_s23, 0  ;;  %p83_p3 = scmp.ne.s32.totalorder %s836_s19, %s832_s18 }
   0xa   : > { %s1106_s26 = smov (%p35_p0, %s33_s26), 0  ;;  %p84_p5 = scmp.eq.s32.totalorder %s631_s24, 0 }
   0xb   : > { %p932_p4 = por %p78_p2, %p77_p1  ;;  %s65_s29 = ssub.s32 %s848_s22, %s1106_s26 }
   0xc   : > { %p187_p6 = scmp.eq.s32.totalorder %s631_s24, 3  ;;  %p68_p7 = scmp.eq.s32.totalorder %s65_s29, 0 }
   0xd   : > { %p938_p8 = por %p84_p5, %p83_p3  ;;  %p193_p10 = scmp.eq.s32.totalorder %s632_s25, 3 }
   0xe   : > { %p942_p9 = por %p187_p6, %p77_p1  ;;  %p679_p12 = scmp.lt.s32.totalorder %s852_s23, 4 }
   0xf   : > { %s947_s7 = scalar_select %p68_p7, %s840_s20, %s70_s27  }
  0x10   : > { %s1093_s6 = scalar_select %p942_p9, 1, 0 }
  0x11   : > { %p949_p11 = por %p193_p10, %p83_p3  ;;  %s223_s9 = sand.u32 1, %s840_s20  }
  0x12   : > { %s635_s10 = sshll.u32 %s223_s9, 3  ;;  %s636_s11 = sshll.u32 %s848_s22, 7 }
  0x13   : > { %s1094_s8 = scalar_select %p949_p11, 1, 0 }
  0x14   : > { %s959_s14 = scalar_lea.hbm %s1085_s1, %s636_s11  ;;  %s227_s15 = scalar_lea.vmem [#allocation2], %s635_s10 }
  0x15   : > { %s235_s16 = sshll.u32 %s227_s15, 4  ;;  %p965_p13 = pnand %p679_p12, %p932_p4  ;;  %s961_s16 = int_to_ptr.vmem [resolvable:$true] %s235_s16 }
  0x16   : > { %s224_s24 = scalar_lea.sflag [#allocation3], %s223_s9  ;;  %s740_s25 = scalar_lea.hbm %s959_s14, 128 }
  0x17   : > { %p741_p2 = scmp.ne.s32.totalorder %s959_s14, %s740_s25  ;;  %p742_p3 = pneg %p965_p13 }
  0x18   : > { %s745_s28 = scalar_lea.hbm %s1085_s1, 512  ;;  %p746_p4 = scmp.lt.u32.totalorder %s959_s14, %s1085_s1 }
  0x19   : > { %p743_p5 = pnand %p742_p3, %p741_p2  ;;  %p747_p7 = scmp.lt.u32.totalorder %s745_s28, %s740_s25 }
  0x1a   : > { %p749_p12 = scmp.lt.u32.totalorder %s740_s25, %s959_s14 }
  0x1b   : > { %p744_p6 = pneg %p743_p5  ;;  %p748_p10 = por %p747_p7, %p746_p4 }
  0x1d   : > { %p750_p0 = por %p749_p12, %p748_p10 }
  0x1f   : > { %p751_p1 = pnand %p750_p0, %p744_p6 }
  0x21   : > { %754 = shalt.err (!%p751_p1)
}
  0x22   : > { %s755_s9 = scalar_lea.vmem %s961_s16, 128  ;;  %s854_s12 = smov [#allocation2]  }
  0x23   : > { %p756_p2 = scmp.ne.s32.totalorder %s961_s16, %s755_s9  ;;  %s760_s13 = sshll.u32 %s854_s12, 4  ;;  %s761_s13 = int_to_ptr.vmem [resolvable:$false] %s760_s13 }
  0x24   : > { %s762_s15 = scalar_lea.vmem %s761_s13, 256  ;;  %p763_p9 = scmp.lt.s32.totalorder %s961_s16, %s761_s13 }
  0x25   : > { %p758_p5 = pnand %p756_p2, %p742_p3  ;;  %p764_p4 = scmp.lt.s32.totalorder %s762_s15, %s755_s9 }
  0x27   : > { %p759_p11 = pneg %p758_p5  ;;  %p765_p7 = por %p764_p4, %p763_p9 }
  0x29   : > { %p766_p10 = pnand %p765_p7, %p759_p11 }
  0x2b   : > { %769 = shalt.err (!%p766_p10)
}
  0x2c   : > { %674 = dma.hbm_to_vmem [thread:$0]  (!%p965_p13), %s959_s14, 128, %s961_s16, %s224_s24  }
  0x2d   : > { %p1096_p0 = scmp.lt.s32.totalorder %s852_s23, 5  ;;  %p1097_p1 = scmp.ge.s32.totalorder %s852_s23, 1 }
  0x2f   : > { %p262_p3 = pnand %p1097_p1, %p1096_p0 }
  0x30   : > { %s1001_s25 = sand.u32 (!%p262_p3), 1, %s836_s19  }
  0x31   : > { %265 = sbr.rel (%p262_p3) target bundleno = 1008 (0x3f0), region = 40  ;;  %s638_s27 = sshll.u32 (!%p262_p3), %s1001_s25, 3 }
  0x32   : > { %s268_s29 = scalar_lea.sflag (!%p262_p3), [#allocation3], %s1001_s25  ;;  %s271_s17 = scalar_lea.vmem (!%p262_p3), [#allocation2], %s638_s27 }
  0x38   : > { %823 = dma.done.wait (%p938_p8), %s268_s29, 128  }
  0x39   : > { %825 = vsyncadd (%p938_p8), %s268_s29, 4294967168  ;;  %p317_p9 = scmp.lt.s32.totalorder %s844_s21, 3  ;;  %v855_v0 = vmov 0.0   ;;  %vm856_vm0 = vmmov 0   ;;  %vm350_vm1 = vcmask 1041408   ;;  %vm403_vm2 = vcmask 1043456  }
  0x3a   : > { %655 = vmatprep.subr.bf16.mxu0 %v855_v0  ;;  %661 = vmatprep.subr.bf16.mxu1 %v855_v0  ;;  %v338_v5 = vld [vmem:[%s271_s17] sm:$0xff]  ;;  %vm346_vm3 = vcmask 31744   ;;  %vm399_vm4 = vcmask 64512   ;;  %v342_v8 = vlaneseq  ;;  %s857_s17 = smov 112   ;;  %s859_s10 = smov 8  }
  0x3b   : > { %s318_s14 = scalar_select %p317_p9, %s844_s21, 3  ;;  %657 = vmatprep.mubr.msk.bf16.mxu0 %vm856_vm0, %v855_v0  ;;  %663 = vmatprep.mubr.msk.bf16.mxu1 %vm856_vm0, %v855_v0  ;;  %v394_v7 = vpack.c.bf16 %v338_v5, %v338_v5 }
  0x3c   : > { %v343_v9 = vshrl.u32 %v342_v8, 7  ;;  %s316_s9 = scalar_lea.vmem [#allocation5], %s638_s27  ;;  %p1098_p11 = scmp.ne.s32.totalorder %s1093_s6, 0 }
  0x3d   : > { %s641_s16 = sshll.u32 %s318_s14, 1  ;;  %s640_s24 = sshll.u32 %s318_s14, 2 }
  0x3e   : > { %s327_s11 = scalar_lea.vmem %s1086_s2, %s641_s16  ;;  %s331_s12 = scalar_lea.vmem %s1087_s3, %s640_s24  ;;  %v397_v10 = vsub.s32 1, %v343_v9  ;;  %v344_v22 = vsub.s32 0, %v343_v9 }
  0x3f   : > { %s323_s29 = scalar_lea.vmem %s1084_s0, %s640_s24  ;;  %v339_v1 = vld [vmem:[%s327_s11] sm:$0x3]  ;;  %s335_s24 = scalar_lea.vmem %s1088_s4, %s641_s16 }
  0x40   : > { %v340_v2 = vld [vmem:[%s331_s12] sm:$0xf]  ;;  %v352_v3 = vsel %vm350_vm1, %v339_v1, 0  ;;  %s858_s16 = smov 16   ;;  %s648_s11 = sshll.u32 %s844_s21, 7 }
  0x41   : > { %v405_v4 = vsel %vm403_vm2, %v340_v2, 0  ;;  %656 = vmatpush3.bf16.msra.mxu0 %v352_v3  ;;  %v337_v6 = vld [vmem:[%s323_s29] sm:$0xf]  ;;  %s500_s30 = sshll.u32 %s316_s9, 4  ;;  %s1035_s15 = scalar_lea.hbm %s1089_s5, %s648_s11  ;;  %s1037_s30 = int_to_ptr.vmem [resolvable:$true] %s500_s30 }
  0x42   : > { %662 = vmatpush3.bf16.msra.mxu1 %v405_v4  ;;  %v341_v11 = vld [vmem:[%s335_s24] sm:$0x3]  ;;  %s486_s29 = scalar_lea.sflag [#allocation4], %s1001_s25  ;;  %s770_s14 = scalar_lea.vmem %s1037_s30, 128 }
  0x43   : > { %v398_v12 = vrot.slane %v341_v11, %v397_v10  ;;  %v345_v23 = vrot.slane %v341_v11, %v344_v22  ;;  %p771_p8 = scmp.ne.s32.totalorder %s1037_s30, %s770_s14  ;;  %s860_s21 = smov [#allocation5]  }
  0x44   : > { %658 = vmatmul.mubr.msk.bf16.vlgmr.msra.gmra.mrb[0].mxu0 %vm346_vm3, %v337_v6  ;;  %s774_s27 = sshll.u32 %s860_s21, 4  ;;  %s775_s27 = int_to_ptr.vmem [resolvable:$false] %s774_s27 }
  0x45   : > { %664 = vmatmul.mubr.msk.bf16.vlgmr.msra.gmra.mrb[0].mxu1 %vm399_vm4, %v394_v7  ;;  %p772_p13 = pnand %p771_p8, %p1098_p11  ;;  %s776_s28 = scalar_lea.vmem %s775_s27, 256 }
  0x46   : > { %p777_p12 = scmp.lt.s32.totalorder %s1037_s30, %s775_s27  ;;  %p778_p2 = scmp.lt.s32.totalorder %s776_s28, %s770_s14 }
  0x47   : > { %p773_p6 = pneg %p772_p13 }
  0x48   : > { %p779_p5 = por %p778_p2, %p777_p12 }
  0x4a   : > { %p780_p4 = pnand %p779_p5, %p773_p6 }
 0x117   : > { %v388_v13 = vpop.f32.mrb[0].mxu0 }
 0x118   : > { %v441_v14 = vpop.f32.mrb[0].mxu1  ;;  %v659_v17 = vpop.f32.mrb[1].mxu0  ;;  %v389_v24 = vadd.f32 %v388_v13, %v345_v23 }
 0x119   : > { %v442_v15 = vadd.f32 %v441_v14, %v398_v12  ;;  %v665_v16 = vpop.f32.mrb[1].mxu1  ;;  %v391_v19 = vpop.f32.mrb[2].mxu0 }
 0x11a   : > { %v444_v18 = vpop.f32.mrb[2].mxu1  ;;  %v660_v21 = vpop.f32.mrb[3].mxu0 }
 0x11b   : > { %455 = vrot.lane.b32.xlu0 %v442_v15, %s857_s17  ;;  %v666_v20 = vpop.f32.mrb[3].mxu1  ;;  %v447_v25 = vadd.f32 %v442_v15, %v389_v24 }
 0x11d   : > { %v646_v26 = vmul.f32 -1.442695, %v447_v25 }
 0x11f   : > { %734 = vpow2.f32 %v646_v26 }
 0x129   : > { %v735_v27 = vpop.eup %734 }
 0x12a   : > { %v451_v28 = vadd.f32 1.0, %v735_v27 }
 0x12c   : > { %736 = vrcp.f32 %v451_v28 }
 0x136   : > { %v737_v29 = vpop.eup %736 }
 0x18d   : > { %v456_v30 = vpop.permute.xlu0 %455 }
 0x18e   : > { %v458_v31 = vmul.f32 %v737_v29, %v456_v30 }
 0x190   : > { %460 = vrot.lane.b32.xlu0 %v458_v31, %s858_s16 }
 0x202   : > { %v461_v32 = vpop.permute.xlu0 %460 }
 0x203   : > { %v463_v33 = vadd.f32 %v461_v32, %v389_v24 }
 0x205   : > { %738 = vtanh.f32 %v463_v33 }
 0x20f   : > { %v739_v34 = vpop.eup %738 }
 0x210   : > { %466 = vrot.lane.b32.xlu1 %v739_v34, %s857_s17 }
 0x282   : > { %v467_v35 = vpop.permute.xlu1 %466 }
 0x283   : > { %v469_v36 = vsub.f32 %v338_v5, %v467_v35 }
 0x285   : > { %471 = vrot.lane.b32.xlu1 %v469_v36, %s859_s10 }
 0x2f7   : > { %v472_v37 = vpop.permute.xlu1 %471 }
 0x2f8   : > { %v474_v38 = vmul.f32 %v737_v29, %v472_v37 }
 0x2fa   : > { %476 = vrot.lane.b32.xlu0 %v474_v38, %s859_s10 }
 0x36c   : > { %v477_v39 = vpop.permute.xlu0 %476 }
 0x36d   : > { %v479_v40 = vadd.f32 %v739_v34, %v477_v39 }
 0x36f   : > { %481 = vrot.lane.b32.xlu1 %v479_v40, %s857_s17 }
 0x3e1   : > { %v482_v41 = vpop.permute.xlu1 %481 }
 0x3e2   : > { %484 = vst.msk [vmem:[%s316_s9] sm:$0xff] %vm399_vm4, %v482_v41 }
 0x3e3   : > { %783 = shalt.err (!%p780_p4)
}
 0x3e4   : > { %s784_s25 = scalar_lea.hbm %s1035_s15, 128  ;;  %s788_s16 = scalar_lea.hbm %s1089_s5, 512 }
 0x3e5   : > { %p785_p7 = scmp.ne.s32.totalorder %s1035_s15, %s784_s25  ;;  %p789_p1 = scmp.lt.u32.totalorder %s1035_s15, %s1089_s5 }
 0x3e6   : > { %p790_p3 = scmp.lt.u32.totalorder %s788_s16, %s784_s25  ;;  %p792_p8 = scmp.lt.u32.totalorder %s784_s25, %s1035_s15 }
 0x3e7   : > { %p786_p10 = pnand %p785_p7, %p1098_p11 }
 0x3e8   : > { %p791_p9 = por %p790_p3, %p789_p1 }
 0x3e9   : > { %p787_p0 = pneg %p786_p10 }
 0x3ea   : > { %p793_p13 = por %p792_p8, %p791_p9 }
 0x3ec   : > { %p794_p6 = pnand %p793_p13, %p787_p0 }
 0x3ee   : > { %797 = shalt.err (!%p794_p6)
}
 0x3ef   : > { %669 = dma.vmem_to_hbm [thread:$0]  (%p1098_p11), %s1037_s30, 128, %s1035_s15, %s486_s29  }
 0x3f0 PF: > { %p680_p12 = scmp.ge.s32.totalorder %s852_s23, 2  ;;  %s512_s9 = sand.u32 1, %s832_s18  }
 0x3f1   : > { %p1099_p2 = scmp.ne.s32.totalorder %s1094_s8, 0  ;;  %s513_s12 = scalar_lea.sflag [#allocation4], %s512_s9 }
 0x3f3   : > { %p676_p5 = pnand %p680_p12, %p1099_p2 }
 0x3f5   : > { %827 = dma.done.wait (!%p676_p5), %s513_s12, 128  }
 0x3f6   : > { %829 = vsyncadd (!%p676_p5), %s513_s12, 4294967168  ;;  %s21_s23 = sadd.s32 1, %s852_s23   ;;  %s1100_s18 = smov %s836_s19 }
 0x3f7   : > { %p18_p4 = scmp.ge.s32.totalorder %s21_s23, 6   ;;  %s1101_s19 = smov %s840_s20 }
 0x3f8   : > { %s1102_s20 = smov %s947_s7  ;;  %s1103_s21 = smov %s848_s22 }
 0x3f9   : > { %s1104_s22 = smov %s1106_s26  ;;  %20 = sbr.rel (!%p18_p4) target bundleno = 6 (0x6), region = 97 }
 0x400   :  { %518 = vsyncpa [#allocation3], 1 }
 0x401   :  { %520 = vsyncpa [#allocation3 + $0x1], 1 }
 0x402   :  { %521 = vsyncpa [#allocation4], 1 }
 0x403   :  { %523 = vsyncpa [#allocation4 + $0x1], 1 }

</bundles_post_ra>
